<compile_context>
chip_gen: v7x
topology: tpu7x:2x2x1
jax: 0.10.0
libtpu: 0.0.40
codegen_flags: <defaults>
</compile_context>

<pallas_src>
import jax
import jax.numpy as jnp
from jax.experimental import pallas as pl
from jax.experimental.pallas import tpu as pltpu

_LANE = 128
_BF16_ROWS = 16   # sublane-packing granularity for bf16 batch tiles


def _round_up(n, m):
    return ((n + m - 1) // m) * m


def _cdiv(a, b):
    return -(-a // b)


def make_mlp_kernel(num_layers):
    """Fused MLP kernel body for a fixed number of hidden layers (fused mean/var head)."""

    def kernel(*refs):
        # refs = (x, z, w0, b0, ..., w_{L-1}, b_{L-1}, w_head, b_head, out)
        x_ref, z_ref = refs[0], refs[1]
        out_ref = refs[-1]
        params = refs[2:-1]

        h = x_ref[...]                                    # bf16 (tb, in_pad)
        for i in range(num_layers):
            w = params[2 * i][...]                        # bf16 (fan_in_p, hid_pad)
            b = params[2 * i + 1][...]                    # f32  (1, hid_pad)
            a = jnp.dot(h, w, preferred_element_type=jnp.float32) + b
            if i != num_layers - 1:
                a = jnp.maximum(a, 0.0)                   # ReLU; dropout(p=0) = identity
            # bf16 only as MXU input; bias add / accumulation stay f32.
            # (Precision note: bf16 rounding compounds with depth vs the f32 reference.)
            h = a.astype(jnp.bfloat16)

        wh = params[2 * num_layers][...]                  # bf16 (hid_pad, 2*out_pad)
        bh = params[2 * num_layers + 1][...]              # f32  (1, 2*out_pad)
        # head = [ r_mu | r_log_var ]; each half is out_pad (a multiple of 128)
        # lanes wide, so the slices below are pure vreg selection (no XLU op).
        head = jnp.dot(h, wh, preferred_element_type=jnp.float32) + bh
        half = head.shape[-1] // 2
        mu = head[:, :half]
        log_var = head[:, half:]

        z = z_ref[0, 0]                                   # scalar N(0,1) sample (SMEM)
        # r = z * mu + sqrt(exp(log_var)); exp only on the log-var half.
        out_ref[...] = z * mu + jnp.exp(0.5 * log_var)

    return kernel


def make_mlp_regressor(layer_params, mean_params, var_params, *, batch_tile=1024):
    """One-time parameter padding / head fusion / bf16 cast; returns forward(x, z)."""
    num_layers = len(layer_params)
    in_features = layer_params[0][0].shape[0]
    hidden = layer_params[0][0].shape[1]
    out_dim = mean_params[0].shape[1]

    in_pad = _round_up(in_features, _LANE)
    hid_pad = _round_up(hidden, _LANE)
    out_pad = _round_up(out_dim, _LANE)        # 128-aligned halves -> slice, not roll
    head_pad = 2 * out_pad

    # --- hoisted out of the per-call forward: pad, fuse the two heads, cast bf16 ---
    flat = []
    for li, (w, b) in enumerate(layer_params):
        fi, fo = w.shape
        fi_p = in_pad if li == 0 else hid_pad
        wp = jnp.zeros((fi_p, hid_pad), jnp.float32).at[:fi, :fo].set(w)
        bp = jnp.zeros((1, hid_pad), jnp.float32).at[0, :fo].set(b)
        flat += [wp.astype(jnp.bfloat16), bp]

    (wm, bm), (wv, bv) = mean_params, var_params
    wh = (jnp.zeros((hid_pad, head_pad), jnp.float32)
          .at[:hidden, :out_dim].set(wm)
          .at[:hidden, out_pad:out_pad + out_dim].set(wv))
    bh = (jnp.zeros((1, head_pad), jnp.float32)
          .at[0, :out_dim].set(bm)
          .at[0, out_pad:out_pad + out_dim].set(bv))
    flat += [wh.astype(jnp.bfloat16), bh]
    param_bytes = sum(int(p.size) * p.dtype.itemsize for p in flat)

    kernel = make_mlp_kernel(num_layers)

    def forward(x, z):
        B = x.shape[0]
        x2 = x.reshape(B, -1)                              # x.view(x.size(0), -1)
        assert x2.shape[1] == in_features

        # Balanced batch tiling: 16-row granularity (full bf16 sublane packing),
        # no half-empty trailing tile, and >=2 grid steps when there is enough
        # work so v7x's two TensorCores both get a share of the "parallel" axis.
        n_tiles = max(_cdiv(B, batch_tile), 1)
        if n_tiles == 1 and B > _BF16_ROWS:
            n_tiles = 2
        tb = _round_up(_cdiv(B, n_tiles), _BF16_ROWS)
        b_pad = tb * n_tiles

        # Single pad on the already-bf16 flattened input (no f32 staging buffer).
        xp = jnp.pad(x2.astype(jnp.bfloat16),
                     ((0, b_pad - B), (0, in_pad - in_features)))

        # Explicit VMEM budget: every pipelined BlockSpec holds 2 buffers (the
        # grid-invariant weights included); clamp to physical VMEM with headroom.
        needed = 2 * (tb * in_pad * 2 + tb * out_pad * 4 + param_bytes)
        try:
            phys = int(getattr(pltpu.get_tpu_info(), "vmem_capacity_bytes", 64 << 20))
        except Exception:
            phys = 64 << 20                                # v7x per-core physical
        vmem_limit = int(min(max(needed + (8 << 20), 32 << 20), phys - (8 << 20)))

        flops = 2 * b_pad * (in_pad * hid_pad
                             + (num_layers - 1) * hid_pad * hid_pad
                             + hid_pad * head_pad)
        cost = pl.CostEstimate(
            flops=flops,
            transcendentals=b_pad * out_pad,
            bytes_accessed=b_pad * in_pad * 2 + b_pad * out_pad * 4 + param_bytes,
        )

        in_specs = [
            pl.BlockSpec((tb, in_pad), lambda i: (i, 0)),          # x: batch-tiled
            pl.BlockSpec(memory_space=pltpu.MemorySpace.SMEM),     # z: scalar in SMEM
        ]
        # Weights/biases: full array, constant index_map -> VMEM-resident across steps.
        in_specs += [pl.BlockSpec(p.shape, lambda i: (0, 0)) for p in flat]

        out = pl.pallas_call(
            kernel,
            out_shape=jax.ShapeDtypeStruct((b_pad, out_pad), jnp.float32),
            grid=(n_tiles,),
            in_specs=in_specs,
            out_specs=pl.BlockSpec((tb, out_pad), lambda i: (i, 0)),
            compiler_params=pltpu.CompilerParams(
                dimension_semantics=("parallel",),    # shard batch grid across TCs
                vmem_limit_bytes=vmem_limit,
            ),
            cost_estimate=cost,
        )(xp, jnp.asarray(z, jnp.float32).reshape(1, 1), *flat)

        return out[:B, :out_dim]

    return forward


def ref_forward(x, z, layer_params, mean_params, var_params):
    """Pure-JAX f32 reference matching the PyTorch forward exactly."""
    h = x.reshape(x.shape[0], -1)
    L = len(layer_params)
    for i, (w, b) in enumerate(layer_params):
        h = h @ w + b
        if i != L - 1:
            h = jnp.maximum(h, 0.0)
    r_mu = h @ mean_params[0] + mean_params[1]
    r_log_var = h @ var_params[0] + var_params[1]
    r_sig = jnp.exp(r_log_var)
    return z * r_mu + jnp.sqrt(r_sig)


def _init_linear(key, fan_in, fan_out):
    """Deterministic PyTorch-style nn.Linear init: U(-1/sqrt(fan_in), 1/sqrt(fan_in)).
    Weights stored transposed vs PyTorch as (in, out) so layers are `h @ W + b`."""
    kw, kb = jax.random.split(key)
    lim = 1.0 / jnp.sqrt(jnp.float32(fan_in))
    w = jax.random.uniform(kw, (fan_in, fan_out), jnp.float32, -lim, lim)
    b = jax.random.uniform(kb, (fan_out,), jnp.float32, -lim, lim)
    return w, b


if __name__ == "__main__":
    B = 2
    input_size = 16
    hidden_size = 32
    num_layers = 3
    output_size = 4    # final output dim = output_size * input_size = 64

    key = jax.random.PRNGKey(0)
    kit = iter(jax.random.split(key, 2 * num_layers + 8))

    # nn.ModuleList: Linear(in, h), (num_layers-2) x Linear(h, h), Linear(h, h)
    layer_params = [_init_linear(next(kit), input_size, hidden_size)]
    for _ in range(num_layers - 2):
        layer_params.append(_init_linear(next(kit), hidden_size, hidden_size))
    layer_params.append(_init_linear(next(kit), hidden_size, hidden_size))

    mean_params = _init_linear(next(kit), hidden_size, output_size * input_size)
    var_params = _init_linear(next(kit), hidden_size, output_size * input_size)

    x = jax.random.normal(next(kit), (B, input_size), jnp.float32)
    # Normal(0, 1).sample() -> single scalar sample shared across the whole output.
    z = jax.random.normal(next(kit), (), jnp.float32)

    forward = make_mlp_regressor(layer_params, mean_params, var_params)
    out = jax.block_until_ready(forward(x, z))

    ref = ref_forward(x, z, layer_params, mean_params, var_params)
    assert out.shape == (B, output_size * input_size)
    assert out.dtype == jnp.float32
    # bf16 matmul inputs -> loose tolerance vs the f32 reference.
    assert jnp.allclose(out, ref, atol=5e-2, rtol=5e-2), float(jnp.max(jnp.abs(out - ref)))
    print("KERNEL_OK")
</pallas_src>

<mosaic_0001>
module attributes {stable_mosaic.version = 11 : i64} {
  func.func @kernel(%arg0: i32, %arg1: memref<16x128xbf16, #tpu.memory_space<vmem>>, %arg2: memref<1x1xf32, #tpu.memory_space<smem>>, %arg3: memref<128x128xbf16, #tpu.memory_space<vmem>>, %arg4: memref<1x128xf32, #tpu.memory_space<vmem>>, %arg5: memref<128x128xbf16, #tpu.memory_space<vmem>>, %arg6: memref<1x128xf32, #tpu.memory_space<vmem>>, %arg7: memref<128x128xbf16, #tpu.memory_space<vmem>>, %arg8: memref<1x128xf32, #tpu.memory_space<vmem>>, %arg9: memref<128x256xbf16, #tpu.memory_space<vmem>>, %arg10: memref<1x256xf32, #tpu.memory_space<vmem>>, %arg11: memref<16x128xf32, #tpu.memory_space<vmem>>) attributes {dimension_semantics = [#tpu.dimension_semantics<parallel>], iteration_bounds = array<i64: 1>, scalar_prefetch = 0 : i64, scratch_operands = 0 : i64, tpu.core_type = #tpu.core_type<tc>, window_params = [{transform_indices = @transform_0, window_bounds = array<i64: 16, 128>}, {transform_indices = @transform_1, window_bounds = array<i64: 1, 1>}, {pipeline_mode = #tpu.pipeline_mode<synchronous>, transform_indices = @transform_2, window_bounds = array<i64: 128, 128>}, {pipeline_mode = #tpu.pipeline_mode<synchronous>, transform_indices = @transform_3, window_bounds = array<i64: 1, 128>}, {pipeline_mode = #tpu.pipeline_mode<synchronous>, transform_indices = @transform_4, window_bounds = array<i64: 128, 128>}, {pipeline_mode = #tpu.pipeline_mode<synchronous>, transform_indices = @transform_5, window_bounds = array<i64: 1, 128>}, {pipeline_mode = #tpu.pipeline_mode<synchronous>, transform_indices = @transform_6, window_bounds = array<i64: 128, 128>}, {pipeline_mode = #tpu.pipeline_mode<synchronous>, transform_indices = @transform_7, window_bounds = array<i64: 1, 128>}, {pipeline_mode = #tpu.pipeline_mode<synchronous>, transform_indices = @transform_8, window_bounds = array<i64: 128, 256>}, {pipeline_mode = #tpu.pipeline_mode<synchronous>, transform_indices = @transform_9, window_bounds = array<i64: 1, 256>}, {transform_indices = @transform_10, window_bounds = array<i64: 16, 128>}]} {
    %c0 = arith.constant 0 : index
    %c0_0 = arith.constant 0 : index
    %0 = vector.load %arg1[%c0, %c0_0] : memref<16x128xbf16, #tpu.memory_space<vmem>>, vector<16x128xbf16>
    %c0_1 = arith.constant 0 : index
    %c0_2 = arith.constant 0 : index
    %1 = vector.load %arg3[%c0_1, %c0_2] : memref<128x128xbf16, #tpu.memory_space<vmem>>, vector<128x128xbf16>
    %c0_3 = arith.constant 0 : index
    %c0_4 = arith.constant 0 : index
    %2 = vector.load %arg4[%c0_3, %c0_4] : memref<1x128xf32, #tpu.memory_space<vmem>>, vector<1x128xf32>
    %cst = arith.constant dense<0.000000e+00> : vector<16x128xf32>
    %3 = tpu.matmul %0, %1, %cst {dimension_numbers = #tpu.dot_dimension_numbers<[1], [0], [0], [1], [0, 0, 1, 1], [], []>} : vector<16x128xbf16>, vector<128x128xbf16>, vector<16x128xf32> -> vector<16x128xf32>
    %4 = vector.broadcast %2 : vector<1x128xf32> to vector<16x128xf32>
    %5 = arith.addf %3, %4 : vector<16x128xf32>
    %cst_5 = arith.constant 0.000000e+00 : f32
    %6 = vector.broadcast %cst_5 : f32 to vector<16x128xf32>
    %7 = arith.maximumf %5, %6 : vector<16x128xf32>
    %8 = arith.truncf %7 : vector<16x128xf32> to vector<16x128xbf16>
    %c0_6 = arith.constant 0 : index
    %c0_7 = arith.constant 0 : index
    %9 = vector.load %arg5[%c0_6, %c0_7] : memref<128x128xbf16, #tpu.memory_space<vmem>>, vector<128x128xbf16>
    %c0_8 = arith.constant 0 : index
    %c0_9 = arith.constant 0 : index
    %10 = vector.load %arg6[%c0_8, %c0_9] : memref<1x128xf32, #tpu.memory_space<vmem>>, vector<1x128xf32>
    %cst_10 = arith.constant dense<0.000000e+00> : vector<16x128xf32>
    %11 = tpu.matmul %8, %9, %cst_10 {dimension_numbers = #tpu.dot_dimension_numbers<[1], [0], [0], [1], [0, 0, 1, 1], [], []>} : vector<16x128xbf16>, vector<128x128xbf16>, vector<16x128xf32> -> vector<16x128xf32>
    %12 = vector.broadcast %10 : vector<1x128xf32> to vector<16x128xf32>
    %13 = arith.addf %11, %12 : vector<16x128xf32>
    %cst_11 = arith.constant 0.000000e+00 : f32
    %14 = vector.broadcast %cst_11 : f32 to vector<16x128xf32>
    %15 = arith.maximumf %13, %14 : vector<16x128xf32>
    %16 = arith.truncf %15 : vector<16x128xf32> to vector<16x128xbf16>
    %c0_12 = arith.constant 0 : index
    %c0_13 = arith.constant 0 : index
    %17 = vector.load %arg7[%c0_12, %c0_13] : memref<128x128xbf16, #tpu.memory_space<vmem>>, vector<128x128xbf16>
    %c0_14 = arith.constant 0 : index
    %c0_15 = arith.constant 0 : index
    %18 = vector.load %arg8[%c0_14, %c0_15] : memref<1x128xf32, #tpu.memory_space<vmem>>, vector<1x128xf32>
    %cst_16 = arith.constant dense<0.000000e+00> : vector<16x128xf32>
    %19 = tpu.matmul %16, %17, %cst_16 {dimension_numbers = #tpu.dot_dimension_numbers<[1], [0], [0], [1], [0, 0, 1, 1], [], []>} : vector<16x128xbf16>, vector<128x128xbf16>, vector<16x128xf32> -> vector<16x128xf32>
    %20 = vector.broadcast %18 : vector<1x128xf32> to vector<16x128xf32>
    %21 = arith.addf %19, %20 : vector<16x128xf32>
    %22 = arith.truncf %21 : vector<16x128xf32> to vector<16x128xbf16>
    %c0_17 = arith.constant 0 : index
    %c0_18 = arith.constant 0 : index
    %23 = vector.load %arg9[%c0_17, %c0_18] : memref<128x256xbf16, #tpu.memory_space<vmem>>, vector<128x256xbf16>
    %c0_19 = arith.constant 0 : index
    %c0_20 = arith.constant 0 : index
    %24 = vector.load %arg10[%c0_19, %c0_20] : memref<1x256xf32, #tpu.memory_space<vmem>>, vector<1x256xf32>
    %cst_21 = arith.constant dense<0.000000e+00> : vector<16x256xf32>
    %25 = tpu.matmul %22, %23, %cst_21 {dimension_numbers = #tpu.dot_dimension_numbers<[1], [0], [0], [1], [0, 0, 1, 1], [], []>} : vector<16x128xbf16>, vector<128x256xbf16>, vector<16x256xf32> -> vector<16x256xf32>
    %26 = vector.broadcast %24 : vector<1x256xf32> to vector<16x256xf32>
    %27 = arith.addf %25, %26 : vector<16x256xf32>
    %28 = vector.extract_strided_slice %27 {offsets = [0, 0], sizes = [16, 128], strides = [1, 1]} : vector<16x256xf32> to vector<16x128xf32>
    %29 = vector.extract_strided_slice %27 {offsets = [0, 128], sizes = [16, 128], strides = [1, 1]} : vector<16x256xf32> to vector<16x128xf32>
    %c0_22 = arith.constant 0 : index
    %c0_23 = arith.constant 0 : index
    %30 = memref.load %arg2[%c0_22, %c0_23] : memref<1x1xf32, #tpu.memory_space<smem>>
    %31 = vector.broadcast %30 : f32 to vector<16x128xf32>
    %32 = arith.mulf %31, %28 : vector<16x128xf32>
    %cst_24 = arith.constant 5.000000e-01 : f32
    %33 = vector.broadcast %cst_24 : f32 to vector<16x128xf32>
    %34 = arith.mulf %33, %29 : vector<16x128xf32>
    %35 = math.exp %34 : vector<16x128xf32>
    %36 = arith.addf %32, %35 : vector<16x128xf32>
    %c0_25 = arith.constant 0 : index
    %c0_26 = arith.constant 0 : index
    %37 = vector.load %arg11[%c0_25, %c0_26] : memref<16x128xf32, #tpu.memory_space<vmem>>, vector<16x128xf32>
    tpu.vector_store %arg11[%c0_25, %c0_26], %36 {strides = array<i32>} : memref<16x128xf32, #tpu.memory_space<vmem>>, vector<16x128xf32>,
    return
  }
  func.func @transform_0(%arg0: i32) -> (i32, i32) {
    %c0_i32 = arith.constant 0 : i32
    %c0_i32_0 = arith.constant 0 : i32
    return %arg0, %c0_i32 : i32, i32
  }
  func.func @transform_1(%arg0: i32) -> (i32, i32) {
    %c0_i32 = arith.constant 0 : i32
    %c0_i32_0 = arith.constant 0 : i32
    %c0_i32_1 = arith.constant 0 : i32
    return %c0_i32, %c0_i32_0 : i32, i32
  }
  func.func @transform_2(%arg0: i32) -> (i32, i32) {
    %c0_i32 = arith.constant 0 : i32
    %c0_i32_0 = arith.constant 0 : i32
    %c0_i32_1 = arith.constant 0 : i32
    return %c0_i32, %c0_i32_0 : i32, i32
  }
  func.func @transform_3(%arg0: i32) -> (i32, i32) {
    %c0_i32 = arith.constant 0 : i32
    %c0_i32_0 = arith.constant 0 : i32
    %c0_i32_1 = arith.constant 0 : i32
    return %c0_i32, %c0_i32_0 : i32, i32
  }
  func.func @transform_4(%arg0: i32) -> (i32, i32) {
    %c0_i32 = arith.constant 0 : i32
    %c0_i32_0 = arith.constant 0 : i32
    %c0_i32_1 = arith.constant 0 : i32
    return %c0_i32, %c0_i32_0 : i32, i32
  }
  func.func @transform_5(%arg0: i32) -> (i32, i32) {
    %c0_i32 = arith.constant 0 : i32
    %c0_i32_0 = arith.constant 0 : i32
    %c0_i32_1 = arith.constant 0 : i32
    return %c0_i32, %c0_i32_0 : i32, i32
  }
  func.func @transform_6(%arg0: i32) -> (i32, i32) {
    %c0_i32 = arith.constant 0 : i32
    %c0_i32_0 = arith.constant 0 : i32
    %c0_i32_1 = arith.constant 0 : i32
    return %c0_i32, %c0_i32_0 : i32, i32
  }
  func.func @transform_7(%arg0: i32) -> (i32, i32) {
    %c0_i32 = arith.constant 0 : i32
    %c0_i32_0 = arith.constant 0 : i32
    %c0_i32_1 = arith.constant 0 : i32
    return %c0_i32, %c0_i32_0 : i32, i32
  }
  func.func @transform_8(%arg0: i32) -> (i32, i32) {
    %c0_i32 = arith.constant 0 : i32
    %c0_i32_0 = arith.constant 0 : i32
    %c0_i32_1 = arith.constant 0 : i32
    return %c0_i32, %c0_i32_0 : i32, i32
  }
  func.func @transform_9(%arg0: i32) -> (i32, i32) {
    %c0_i32 = arith.constant 0 : i32
    %c0_i32_0 = arith.constant 0 : i32
    %c0_i32_1 = arith.constant 0 : i32
    return %c0_i32, %c0_i32_0 : i32, i32
  }
  func.func @transform_10(%arg0: i32) -> (i32, i32) {
    %c0_i32 = arith.constant 0 : i32
    %c0_i32_0 = arith.constant 0 : i32
    return %arg0, %c0_i32 : i32, i32
  }
}

</mosaic_0001>

<bundles_post_ra>
// kernel: tpu_custom_call.1
= control target key start
LH: loop header
LB: loop body
LE: loop exit
PB: predicated region body
PF: predicated region fallthrough
CT: control target
= control target key end

     0   :  { %16 = vsyncpa [#allocation4], 0  ;;  %s1195_s0 = inlined_call_operand.hbm [shape: bf16[16,128], index: 0, kind: input, shape index: {}]   ;;  %s1196_s1 = inlined_call_operand.<no memory space> [shape: f32[1,1], index: 1, kind: input, shape index: {}]   ;;  %s1197_s2 = inlined_call_operand.hbm [shape: bf16[128,128], index: 2, kind: input, shape index: {}]   ;;  %s1198_s3 = inlined_call_operand.vmem [shape: f32[1,128], index: 3, kind: input, shape index: {}]   ;;  %s1199_s4 = inlined_call_operand.hbm [shape: bf16[128,128], index: 4, kind: input, shape index: {}]   ;;  %s1200_s5 = inlined_call_operand.vmem [shape: f32[1,128], index: 5, kind: input, shape index: {}]   ;;  %s1201_s6 = inlined_call_operand.hbm [shape: bf16[128,128], index: 6, kind: input, shape index: {}]   ;;  %s1202_s7 = inlined_call_operand.vmem [shape: f32[1,128], index: 7, kind: input, shape index: {}]   ;;  %s1203_s8 = inlined_call_operand.hbm [shape: bf16[128,256], index: 8, kind: input, shape index: {}]   ;;  %s1204_s9 = inlined_call_operand.vmem [shape: f32[1,256], index: 9, kind: input, shape index: {}]   ;;  %s1205_s10 = inlined_call_operand.hbm [shape: f32[16,128], index: 10, kind: output, shape index: {}]  }
   0x1   :  { %17 = vsyncpa [#allocation7], 0 }
   0x2   :  { %18 = vsyncpa [#allocation10], 0 }
   0x3   :  { %19 = vsyncpa [#allocation5], 0  ;;  %s978_s13 = smov [#allocation6]   ;;  %s979_s15 = smov [#allocation9]  }
   0x4   :  { %s39_s14 = sshll.u32 %s978_s13, 4  ;;  %s67_s16 = sshll.u32 %s979_s15, 4  ;;  %s40_s14 = int_to_ptr.vmem [resolvable:$true] %s39_s14  ;;  %s1046_s16 = int_to_ptr.vmem [resolvable:$true] %s67_s16 }
   0x5   :  { %s838_s19 = scalar_lea.hbm %s1197_s2, 1024 }
   0x6   :  { %p839_p0 = scmp.ne.s32.totalorder %s1197_s2, %s838_s19  ;;  %p842_p1 = scmp.lt.u32.totalorder %s838_s19, %s1197_s2 }
   0x8   :  { %p844_p2 = pnand %p842_p1, %p839_p0 }
   0xa   :  { %847 = shalt.err (!%p844_p2)
}
   0xb   :  { %s848_s24 = scalar_lea.vmem %s40_s14, 1024  ;;  %p853_p4 = scmp.lt.s32.totalorder %s40_s14, %s40_s14 }
   0xc   :  { %p849_p3 = scmp.ne.s32.totalorder %s40_s14, %s848_s24  ;;  %p854_p5 = scmp.lt.s32.totalorder %s848_s24, %s848_s24 }
   0xe   :  { %p855_p6 = por %p854_p5, %p853_p4 }
  0x10   :  { %p856_p7 = pnand %p855_p6, %p849_p3 }
  0x12   :  { %859 = shalt.err (!%p856_p7)
}
  0x13   :  { %s980_s25 = smov 64   ;;  %s981_s26 = smov 4  }
  0x14   :  { %45 = dma.hbm_to_vmem [thread:$0]  %s1197_s2, 1024, %s40_s14, [#allocation7], %s980_s25, %s980_s25, %s981_s26  }
  0x15   :  { %s860_s11 = scalar_lea.hbm %s1201_s6, 1024 }
  0x16   :  { %p861_p8 = scmp.ne.s32.totalorder %s1201_s6, %s860_s11  ;;  %p864_p9 = scmp.lt.u32.totalorder %s860_s11, %s1201_s6 }
  0x18   :  { %p866_p10 = pnand %p864_p9, %p861_p8 }
  0x1a   :  { %869 = shalt.err (!%p866_p10)
}
  0x1b   :  { %s870_s18 = scalar_lea.vmem %s1046_s16, 1024  ;;  %p875_p12 = scmp.lt.s32.totalorder %s1046_s16, %s1046_s16 }
  0x1c   :  { %p871_p11 = scmp.ne.s32.totalorder %s1046_s16, %s870_s18  ;;  %p876_p13 = scmp.lt.s32.totalorder %s870_s18, %s870_s18 }
  0x1e   :  { %p877_p0 = por %p876_p13, %p875_p12 }
  0x20   :  { %p878_p1 = pnand %p877_p0, %p871_p11 }
  0x22   :  { %881 = shalt.err (!%p878_p1)
}
  0x23   :  { %73 = dma.hbm_to_vmem [thread:$0]  %s1201_s6, 1024, %s1046_s16, [#allocation10], %s980_s25, %s980_s25, %s981_s26  }
  0x24   :  { %s982_s19 = smov [#allocation3]   ;;  %s983_s21 = smov [#allocation8]  }
  0x25   :  { %s25_s20 = sshll.u32 %s982_s19, 4  ;;  %s53_s22 = sshll.u32 %s983_s21, 4  ;;  %s26_s20 = int_to_ptr.vmem [resolvable:$true] %s25_s20  ;;  %s1083_s22 = int_to_ptr.vmem [resolvable:$true] %s53_s22 }
  0x26   :  { %s882_s27 = scalar_lea.hbm %s1195_s0, 128 }
  0x27   :  { %p883_p2 = scmp.ne.s32.totalorder %s1195_s0, %s882_s27  ;;  %p886_p3 = scmp.lt.u32.totalorder %s882_s27, %s1195_s0 }
  0x29   :  { %p888_p4 = pnand %p886_p3, %p883_p2 }
  0x2b   :  { %891 = shalt.err (!%p888_p4)
}
  0x2c   :  { %s892_s6 = scalar_lea.vmem %s26_s20, 128  ;;  %p897_p6 = scmp.lt.s32.totalorder %s26_s20, %s26_s20 }
  0x2d   :  { %p893_p5 = scmp.ne.s32.totalorder %s26_s20, %s892_s6  ;;  %p898_p7 = scmp.lt.s32.totalorder %s892_s6, %s892_s6 }
  0x2f   :  { %p899_p8 = por %p898_p7, %p897_p6 }
  0x31   :  { %p900_p9 = pnand %p899_p8, %p893_p5 }
  0x33   :  { %903 = shalt.err (!%p900_p9)
}
  0x34   :  { %31 = dma.hbm_to_vmem [thread:$0]  %s1195_s0, 128, %s26_s20, [#allocation4], %s980_s25, %s980_s25, %s981_s26  }
  0x35   :  { %s904_s17 = scalar_lea.hbm %s1199_s4, 1024 }
  0x36   :  { %p905_p10 = scmp.ne.s32.totalorder %s1199_s4, %s904_s17  ;;  %p908_p11 = scmp.lt.u32.totalorder %s904_s17, %s1199_s4 }
  0x38   :  { %p910_p12 = pnand %p908_p11, %p905_p10 }
  0x3a   :  { %913 = shalt.err (!%p910_p12)
}
  0x3b   :  { %s914_s21 = scalar_lea.vmem %s1083_s22, 1024  ;;  %p919_p0 = scmp.lt.s32.totalorder %s1083_s22, %s1083_s22 }
  0x3c   :  { %p915_p13 = scmp.ne.s32.totalorder %s1083_s22, %s914_s21  ;;  %p920_p1 = scmp.lt.s32.totalorder %s914_s21, %s914_s21 }
  0x3e   :  { %p921_p2 = por %p920_p1, %p919_p0 }
  0x40   :  { %p922_p3 = pnand %p921_p2, %p915_p13 }
  0x42   :  { %925 = shalt.err (!%p922_p3)
}
  0x43   :  { %59 = dma.hbm_to_vmem [thread:$0]  %s1199_s4, 1024, %s1083_s22, [#allocation7], %s980_s25, %s980_s25, %s981_s26  }
  0x44   :  { %s984_s23 = smov [#allocation11]   ;;  %s926_s29 = scalar_lea.hbm %s1203_s8, 2048 }
  0x45   :  { %s81_s24 = sshll.u32 %s984_s23, 4  ;;  %p927_p4 = scmp.ne.s32.totalorder %s1203_s8, %s926_s29  ;;  %s82_s24 = int_to_ptr.vmem [resolvable:$true] %s81_s24 }
  0x46   :  { %p930_p5 = scmp.lt.u32.totalorder %s926_s29, %s1203_s8 }
  0x48   :  { %p932_p6 = pnand %p930_p5, %p927_p4 }
  0x4a   :  { %935 = shalt.err (!%p932_p6)
}
  0x4b   :  { %s936_s12 = scalar_lea.vmem %s82_s24, 2048  ;;  %p941_p8 = scmp.lt.s32.totalorder %s82_s24, %s82_s24 }
  0x4c   :  { %p937_p7 = scmp.ne.s32.totalorder %s82_s24, %s936_s12  ;;  %p942_p9 = scmp.lt.s32.totalorder %s936_s12, %s936_s12 }
  0x4e   :  { %p943_p10 = por %p942_p9, %p941_p8 }
  0x50   :  { %p944_p11 = pnand %p943_p10, %p937_p7 }
  0x52   :  { %947 = shalt.err (!%p944_p11)
}
  0x53   :  { %s985_s4 = smov 128   ;;  %s986_s25 = smov 8  }
  0x54   :  { %87 = dma.hbm_to_vmem [thread:$0]  %s1203_s8, 2048, %s82_s24, [#allocation10], %s985_s4, %s985_s4, %s986_s25  }
  0x55   :  { %970 = dma.done.wait [#allocation4], 128  }
  0x56   :  { %971 = vsyncadd [#allocation4], 4294967168 }
  0x57   :  { %972 = dma.done.wait [#allocation7], 2048  }
  0x58   :  { %973 = vsyncadd [#allocation7], 4294965248 }
  0x59   :  { %974 = dma.done.wait [#allocation10], 3072  }
  0x5a   :  { %975 = vsyncadd [#allocation10], 4294964224  ;;  %v987_v0 = vmov 0.0   ;;  %vm988_vm0 = vmmov 0   ;;  %v785_v1 = vld [vmem:[#allocation6] sm:$0xff]   ;;  %v786_v2 = vld [vmem:[#allocation6 + $0x8] sm:$0xff]  }
  0x5b   :  { %712 = vmatprep.subr.bf16.mxu0 %v987_v0  ;;  %728 = vmatprep.mubr.msk.bf16.mxu0 %vm988_vm0, %v987_v0  ;;  %v787_v3 = vld [vmem:[#allocation6 + $0x10] sm:$0xff]   ;;  %v794_v4 = vld [vmem:[#allocation8] sm:$0xff]   ;;  %v788_v5 = vld [vmem:[#allocation6 + $0x18] sm:$0xff]   ;;  %v989_v62 = vmov 0  }
  0x5c   :  { %732 = vmatprep.subr.bf16.mxu1 %v987_v0  ;;  %748 = vmatprep.mubr.msk.bf16.mxu1 %vm988_vm0, %v987_v0  ;;  %v795_v6 = vld [vmem:[#allocation8 + $0x8] sm:$0xff]   ;;  %v789_v7 = vld [vmem:[#allocation6 + $0x20] sm:$0xff]   ;;  %v796_v8 = vld [vmem:[#allocation8 + $0x10] sm:$0xff]  }
  0x5d   :  { %713 = vmatpush3.bf16.msra.mxu0 %v785_v1  ;;  %733 = vmatpush3.bf16.msra.mxu1 %v794_v4  ;;  %v790_v9 = vld [vmem:[#allocation6 + $0x28] sm:$0xff]   ;;  %v797_v10 = vld [vmem:[#allocation8 + $0x18] sm:$0xff]   ;;  %v791_v11 = vld [vmem:[#allocation6 + $0x30] sm:$0xff]  }
  0x5e   :  { %714 = vmatprep.subr.bf16.mxu0 %v987_v0  ;;  %734 = vmatprep.subr.bf16.mxu1 %v987_v0  ;;  %v798_v12 = vld [vmem:[#allocation8 + $0x20] sm:$0xff]   ;;  %v792_v13 = vld [vmem:[#allocation6 + $0x38] sm:$0xff]   ;;  %v799_v14 = vld [vmem:[#allocation8 + $0x28] sm:$0xff]  }
  0x5f   :  { %v793_v15 = vld [vmem:[#allocation3] sm:$0xff]   ;;  %v800_v16 = vld [vmem:[#allocation8 + $0x30] sm:$0xff]   ;;  %v802_v18 = vld [vmem:[#allocation9] sm:$0xff]  }
  0x60   :  { %v801_v17 = vld [vmem:[#allocation8 + $0x38] sm:$0xff]   ;;  %v803_v19 = vld [vmem:[#allocation9 + $0x8] sm:$0xff]   ;;  %v804_v20 = vld [vmem:[#allocation9 + $0x10] sm:$0xff]  }
  0x61   :  { %715 = vmatpush3.bf16.msra.mxu0 %v786_v2  ;;  %735 = vmatpush3.bf16.msra.mxu1 %v795_v6  ;;  %v805_v21 = vld [vmem:[#allocation9 + $0x18] sm:$0xff]   ;;  %v806_v22 = vld [vmem:[#allocation9 + $0x20] sm:$0xff]   ;;  %v807_v23 = vld [vmem:[#allocation9 + $0x28] sm:$0xff]  }
  0x62   :  { %716 = vmatprep.subr.bf16.mxu0 %v987_v0  ;;  %736 = vmatprep.subr.bf16.mxu1 %v987_v0  ;;  %v641_v24 = vld [vmem:[%s1198_s3] ss:$0 sm:$0xff]  ;;  %v808_v34 = vld [vmem:[#allocation9 + $0x30] sm:$0xff]   ;;  %v810_v36 = vld [vmem:[#allocation11] ss:$8 sps:$4 sm:$0xff]  }
  0x63   :  { %v809_v35 = vld [vmem:[#allocation9 + $0x38] sm:$0xff]   ;;  %v812_v37 = vld [vmem:[#allocation11 + $0x4] ss:$8 sps:$4 sm:$0xff]   ;;  %v816_v41 = vld [vmem:[#allocation11 + $0x20] ss:$8 sps:$4 sm:$0xff]  }
  0x64   :  { %v815_v38 = vld [vmem:[#allocation11 + $0x14] ss:$8 sps:$4 sm:$0xff]   ;;  %v813_v39 = vld [vmem:[#allocation11 + $0x10] ss:$8 sps:$4 sm:$0xff]   ;;  %v818_v40 = vld [vmem:[#allocation11 + $0x24] ss:$8 sps:$4 sm:$0xff]  }
  0x65   :  { %717 = vmatpush3.bf16.msra.mxu0 %v787_v3  ;;  %737 = vmatpush3.bf16.msra.mxu1 %v796_v8  ;;  %v821_v42 = vld [vmem:[#allocation11 + $0x34] ss:$8 sps:$4 sm:$0xff]   ;;  %v819_v43 = vld [vmem:[#allocation11 + $0x30] ss:$8 sps:$4 sm:$0xff]   ;;  %v824_v44 = vld [vmem:[#allocation11 + $0x44] ss:$8 sps:$4 sm:$0xff]  }
  0x66   :  { %718 = vmatprep.subr.bf16.mxu0 %v987_v0  ;;  %738 = vmatprep.subr.bf16.mxu1 %v987_v0  ;;  %v822_v45 = vld [vmem:[#allocation11 + $0x40] ss:$8 sps:$4 sm:$0xff]   ;;  %v827_v46 = vld [vmem:[#allocation11 + $0x54] ss:$8 sps:$4 sm:$0xff]   ;;  %v825_v47 = vld [vmem:[#allocation11 + $0x50] ss:$8 sps:$4 sm:$0xff]  }
  0x67   :  { %v830_v48 = vld [vmem:[#allocation11 + $0x64] ss:$8 sps:$4 sm:$0xff]   ;;  %v828_v49 = vld [vmem:[#allocation11 + $0x60] ss:$8 sps:$4 sm:$0xff]   ;;  %v651_v50 = vld [vmem:[%s1200_s5] ss:$0 sm:$0xff] }
  0x68   :  { %v833_v60 = vld [vmem:[#allocation11 + $0x74] ss:$8 sps:$4 sm:$0xff]   ;;  %v831_v61 = vld [vmem:[#allocation11 + $0x70] ss:$8 sps:$4 sm:$0xff]  }
  0x69   :  { %719 = vmatpush3.bf16.msra.mxu0 %v788_v5  ;;  %739 = vmatpush3.bf16.msra.mxu1 %v797_v10  ;;  %v660_v63 = vld [vmem:[%s1202_s7] ss:$0 sm:$0xff] }
  0x6a   :  { %720 = vmatprep.subr.bf16.mxu0 %v987_v0  ;;  %740 = vmatprep.subr.bf16.mxu1 %v987_v0  ;;  %v473_v10 = vld [vmem:[%s1204_s9] sm:$0x3]  ;;  %s990_s9 = smov [#allocation12]  }
  0x6b   :  { %s627_s19 = sshll.u32 %s990_s9, 4  ;;  %s628_s19 = int_to_ptr.vmem [resolvable:$true] %s627_s19 }
  0x6c   :  { %s948_s21 = scalar_lea.vmem %s628_s19, 256  ;;  %p953_p13 = scmp.lt.s32.totalorder %s628_s19, %s628_s19 }
  0x6d   :  { %721 = vmatpush3.bf16.msra.mxu0 %v789_v7  ;;  %741 = vmatpush3.bf16.msra.mxu1 %v798_v12  ;;  %v475_v7 = vlaneseq  ;;  %p949_p12 = scmp.ne.s32.totalorder %s628_s19, %s948_s21  ;;  %p954_p0 = scmp.lt.s32.totalorder %s948_s21, %s948_s21 }
  0x6e   :  { %722 = vmatprep.subr.bf16.mxu0 %v987_v0  ;;  %742 = vmatprep.subr.bf16.mxu1 %v987_v0 }
  0x6f   :  { %v476_v8 = vshrl.u32 %v475_v7, 7  ;;  %p955_p1 = por %p954_p0, %p953_p13 }
  0x71   :  { %723 = vmatpush3.bf16.msra.mxu0 %v790_v9  ;;  %743 = vmatpush3.bf16.msra.mxu1 %v799_v14  ;;  %v481_v9 = vsub.s32 1, %v476_v8  ;;  %p956_p2 = pnand %p955_p1, %p949_p12 }
  0x72   :  { %724 = vmatprep.subr.bf16.mxu0 %v987_v0  ;;  %744 = vmatprep.subr.bf16.mxu1 %v987_v0 }
  0x75   :  { %725 = vmatpush3.bf16.msra.mxu0 %v791_v11  ;;  %745 = vmatpush3.bf16.msra.mxu1 %v800_v16  ;;  %v482_v11 = vrot.slane %v473_v10, %v481_v9 }
  0x76   :  { %726 = vmatprep.subr.bf16.mxu0 %v987_v0  ;;  %746 = vmatprep.subr.bf16.mxu1 %v987_v0 }
  0x79   :  { %727 = vmatpush3.bf16.msra.mxu0 %v792_v13  ;;  %747 = vmatpush3.bf16.msra.mxu1 %v801_v17 }
  0x7a   :  { %752 = vmatprep.subr.bf16.mxu0 %v987_v0  ;;  %565 = vmatprep.subr.bf16.mxu1 %v812_v37 }
  0x7c   :  { %729 = vmatmul.mubr.bf16.vlgmr.msra.gmra.mrb[0].mxu0 %v793_v15 }
  0x7d   :  { %768 = vmatprep.mubr.msk.bf16.mxu0 %vm988_vm0, %v987_v0  ;;  %753 = vmatpush3.bf16.msra.mxu0 %v802_v18 }
  0x7e   :  { %754 = vmatprep.subr.bf16.mxu0 %v987_v0 }
  0x81   :  { %755 = vmatpush3.bf16.msra.mxu0 %v803_v19  ;;  %v477_v19 = vsub.s32 0, %v476_v8 }
  0x82   :  { %756 = vmatprep.subr.bf16.mxu0 %v987_v0 }
  0x85   :  { %757 = vmatpush3.bf16.msra.mxu0 %v804_v20 }
  0x86   :  { %758 = vmatprep.subr.bf16.mxu0 %v987_v0 }
  0x89   :  { %759 = vmatpush3.bf16.msra.mxu0 %v805_v21 }
  0x8a   :  { %760 = vmatprep.subr.bf16.mxu0 %v987_v0 }
  0x8d   :  { %761 = vmatpush3.bf16.msra.mxu0 %v806_v22 }
  0x8e   :  { %762 = vmatprep.subr.bf16.mxu0 %v987_v0 }
  0x91   :  { %763 = vmatpush3.bf16.msra.mxu0 %v807_v23  ;;  %v478_v23 = vrot.slane %v473_v10, %v477_v19 }
  0x92   :  { %764 = vmatprep.subr.bf16.mxu0 %v987_v0 }
  0x95   :  { %765 = vmatpush3.bf16.msra.mxu0 %v808_v34 }
  0x96   :  { %766 = vmatprep.subr.bf16.mxu0 %v987_v0 }
  0x99   :  { %767 = vmatpush3.bf16.msra.mxu0 %v809_v35 }
 0x14f   :  { %v219_v25 = vpop.f32.mrb[0].mxu0 }
 0x150   :  { %v220_v26 = vadd.f32 %v641_v24, %v219_v25  ;;  %v730_v27 = vpop.f32.mrb[1].mxu0  ;;  %v609_v25 = vstv %s1196_s1 }
 0x151   :  { %v222_v28 = vpop.f32.mrb[2].mxu0 }
 0x152   :  { %v223_v29 = vadd.f32 %v641_v24, %v222_v28  ;;  %v731_v30 = vpop.f32.mrb[3].mxu0  ;;  %v226_v31 = vmax.f32 %v220_v26, 0.0 }
 0x154   :  { %v227_v32 = vmax.f32 %v223_v29, 0.0 }
 0x156   :  { %v228_v33 = vpack.c.bf16 %v227_v32, %v226_v31 }
 0x158   :  { %749 = vmatmul.mubr.bf16.vlgmr.msra.gmra.mrb[0].mxu1 %v228_v33 }
 0x159   :  { %566 = vmatpush1.bf16.msra.mxu1 %v810_v36  ;;  %597 = vmatprep.mubr.bf16.mxu1 %v989_v62 }
 0x15a   :  { %567 = vmatprep.subr.bf16.mxu1 %v815_v38 }
 0x15d   :  { %568 = vmatpush1.bf16.msra.mxu1 %v813_v39 }
 0x15e   :  { %569 = vmatprep.subr.bf16.mxu1 %v818_v40 }
 0x161   :  { %570 = vmatpush1.bf16.msra.mxu1 %v816_v41 }
 0x162   :  { %571 = vmatprep.subr.bf16.mxu1 %v821_v42 }
 0x165   :  { %572 = vmatpush1.bf16.msra.mxu1 %v819_v43 }
 0x166   :  { %573 = vmatprep.subr.bf16.mxu1 %v824_v44 }
 0x169   :  { %574 = vmatpush1.bf16.msra.mxu1 %v822_v45 }
 0x16a   :  { %575 = vmatprep.subr.bf16.mxu1 %v827_v46 }
 0x16d   :  { %576 = vmatpush1.bf16.msra.mxu1 %v825_v47 }
 0x16e   :  { %577 = vmatprep.subr.bf16.mxu1 %v830_v48 }
 0x171   :  { %578 = vmatpush1.bf16.msra.mxu1 %v828_v49 }
 0x172   :  { %579 = vmatprep.subr.bf16.mxu1 %v833_v60 }
 0x175   :  { %580 = vmatpush1.bf16.msra.mxu1 %v831_v61 }
 0x22b   :  { %v334_v51 = vpop.f32.mrb[0].mxu1 }
 0x22c   :  { %v335_v52 = vadd.f32 %v651_v50, %v334_v51  ;;  %v750_v53 = vpop.f32.mrb[1].mxu1 }
 0x22d   :  { %v337_v54 = vpop.f32.mrb[2].mxu1 }
 0x22e   :  { %v338_v55 = vadd.f32 %v651_v50, %v337_v54  ;;  %v751_v56 = vpop.f32.mrb[3].mxu1  ;;  %v341_v57 = vmax.f32 %v335_v52, 0.0 }
 0x230   :  { %v342_v58 = vmax.f32 %v338_v55, 0.0 }
 0x232   :  { %v343_v59 = vpack.c.bf16 %v342_v58, %v341_v57 }
 0x234   :  { %769 = vmatmul.mubr.bf16.vlgmr.msra.gmra.mrb[4].mxu0 %v343_v59 }
 0x307   :  { %v449_v0 = vpop.f32.mrb[4].mxu0 }
 0x308   :  { %v770_v1 = vpop.f32.mrb[5].mxu0  ;;  %v450_v3 = vadd.f32 %v660_v63, %v449_v0 }
 0x309   :  { %v452_v2 = vpop.f32.mrb[6].mxu0 }
 0x30a   :  { %v453_v4 = vadd.f32 %v660_v63, %v452_v2  ;;  %v771_v5 = vpop.f32.mrb[7].mxu0 }
 0x30c   :  { %v456_v6 = vpack.c.bf16 %v453_v4, %v450_v3 }
 0x30e   :  { %598 = vmatmul.mubr.bf16.vlgmr.msra.gmra.mrb[4].mxu1 %v456_v6 }
 0x3e1   :  { %v599_v12 = vpop.f32.mrb[4].mxu1 }
 0x3e2   :  { %v601_v13 = vpop.f32.mrb[5].mxu1  ;;  %v600_v24 = vadd.f32 %v599_v12, %v478_v23 }
 0x3e3   :  { %v602_v14 = vadd.f32 %v601_v13, %v482_v11  ;;  %v603_v15 = vpop.f32.mrb[6].mxu1 }
 0x3e4   :  { %v605_v16 = vpop.f32.mrb[7].mxu1  ;;  %v604_v26 = vadd.f32 %v603_v15, %v478_v23  ;;  %v610_v27 = vmul.f32 %v609_v25, %v600_v24 }
 0x3e5   :  { %v612_v17 = vmul.f32 0.5, %v602_v14  ;;  %v606_v18 = vadd.f32 %v605_v16, %v482_v11 }
 0x3e6   :  { %v611_v29 = vmul.f32 %v609_v25, %v604_v26 }
 0x3e7   :  { %v614_v20 = vmul.f32 1.442695, %v612_v17  ;;  %v613_v21 = vmul.f32 0.5, %v606_v18 }
 0x3e9   :  { %834 = vpow2.f32 %v614_v20  ;;  %v616_v22 = vmul.f32 1.442695, %v613_v21 }
 0x3eb   :  { %836 = vpow2.f32 %v616_v22 }
 0x3f3   :  { %v835_v28 = vpop.eup %834 }
 0x3f4   :  { %v618_v30 = vadd.f32 %v835_v28, %v610_v27 }
 0x3f5   :  { %v837_v31 = vpop.eup %836 }
 0x3f6   :  { %v619_v32 = vadd.f32 %v837_v31, %v611_v29  ;;  %620 = vst [vmem:[#allocation12] sm:$0xff] %v618_v30 }
 0x3f8   :  { %621 = vst [vmem:[#allocation12 + $0x8] sm:$0xff] %v619_v32 }
 0x3f9   :  { %959 = shalt.err (!%p956_p2)
}
 0x3fa   :  { %s960_s20 = scalar_lea.hbm %s1205_s10, 256 }
 0x3fb   :  { %p961_p3 = scmp.ne.s32.totalorder %s1205_s10, %s960_s20  ;;  %p964_p4 = scmp.lt.u32.totalorder %s960_s20, %s1205_s10 }
 0x3fd   :  { %p966_p5 = pnand %p964_p4, %p961_p3 }
 0x3ff   :  { %969 = shalt.err (!%p966_p5)
}
 0x400   :  { %633 = dma.vmem_to_hbm [thread:$0]  %s628_s19, 256, %s1205_s10, [#allocation5], %s985_s4, %s985_s4, %s986_s25  }
 0x401   :  { %976 = dma.done.wait [#allocation5], 256  }
 0x402   :  { %977 = vsyncadd [#allocation5], 4294967040 }
 0x403   :  { %637 = vsyncpa [#allocation4], 1 }
 0x404   :  { %638 = vsyncpa [#allocation7], 1 }
 0x405   :  { %639 = vsyncpa [#allocation10], 1 }
 0x406   :  { %640 = vsyncpa [#allocation5], 1 }

</bundles_post_ra>
